<compile_context>
chip_gen: v6e
topology: v6e:2x2x1
jax: 0.10.0
libtpu: 0.0.40
codegen_flags: <defaults>
</compile_context>

<pallas_src>
import functools

import jax
import jax.numpy as jnp
from jax import lax
from jax.experimental import pallas as pl
from jax.experimental.pallas import tpu as pltpu


def rbm_cd_kernel(v_ref, w_ref, wt_ref, bv_ref, bh_ref, uh_ref, uv_ref,
                  vk_ref, *, cd_steps):
    # v_ref:  [TB, nv]            f32   visible units (this batch tile)
    # w_ref:  [nv, nh]            bf16  weights (VMEM-resident across tiles)
    # wt_ref: [nh, nv]            bf16  precomputed W^T
    # bv_ref: [1, nv]             f32
    # bh_ref: [1, nh]             f32
    # uh_ref: [cd_steps, TB, nh]  f32   uniform noise for h sampling
    # uv_ref: [cd_steps, TB, nv]  f32   uniform noise for v sampling
    # vk_ref: [TB, nv]            f32   reconstructed visible units (output)
    tb, nv = vk_ref.shape
    nh = w_ref.shape[1]

    w = w_ref[...]
    wt = wt_ref[...]
    # Hoist bias broadcasts out of the CD loop (JAX does not CSE broadcast_in_dim).
    bh_b = jnp.broadcast_to(bh_ref[...], (tb, nh))
    bv_b = jnp.broadcast_to(bv_ref[...], (tb, nv))

    def cd_step(step, vk):
        # sample_h: p(h|v) = sigmoid(vk @ W + bh)   (bf16 MXU, f32 accumulate)
        ph = jax.nn.sigmoid(
            jnp.dot(vk.astype(jnp.bfloat16), w,
                    preferred_element_type=jnp.float32) + bh_b)
        hk = jnp.where(ph - uh_ref[step] > 0.0, 1.0, 0.0)   # {0,1} exact
        # sample_v: p(v|h) = sigmoid(hk @ W^T + bv)
        pv = jax.nn.sigmoid(
            jnp.dot(hk.astype(jnp.bfloat16), wt,
                    preferred_element_type=jnp.float32) + bv_b)
        return jnp.where(pv - uv_ref[step] > 0.0, 1.0, 0.0)

    vk = v_ref[...]
    if cd_steps <= 8:
        # Static unroll for typical CD-k (k small).
        for s in range(cd_steps):
            vk = cd_step(s, vk)
    else:
        # Bound code size / register pressure for large k.
        vk = lax.fori_loop(0, cd_steps, cd_step, vk)

    vk_ref[...] = vk


def rbm_forward(v, W, bv, bh, *, seed=0, cd_steps=1, batch_tile=128):
    """Returns (v, vk), matching RBM.forward."""
    B, nv = v.shape
    nv_w, nh = W.shape
    assert nv == nv_w

    TB = batch_tile
    B_pad = ((B + TB - 1) // TB) * TB   # pad batch so the MXU M-dim is filled

    v_f32 = v.astype(jnp.float32)
    if B_pad != B:
        v_f32 = jnp.pad(v_f32, ((0, B_pad - B), (0, 0)))

    # bf16 weights halve HBM/VMEM footprint; W^T precomputed once (no in-loop
    # transpose on the XLU).
    w_bf16 = W.astype(jnp.bfloat16)
    wt_bf16 = jnp.transpose(w_bf16)
    bv2d = bv.reshape(1, nv).astype(jnp.float32)
    bh2d = bh.reshape(1, nh).astype(jnp.float32)

    # torch.rand draws -> host-side jax.random uniforms streamed into the
    # kernel (TPU hardware PRNG primitives don't lower in interpret/CPU mode).
    key = jax.random.PRNGKey(seed)
    k_h, k_v = jax.random.split(key)
    uh = jax.random.uniform(k_h, (cd_steps, B_pad, nh), dtype=jnp.float32)
    uv = jax.random.uniform(k_v, (cd_steps, B_pad, nv), dtype=jnp.float32)

    grid = (B_pad // TB,)
    vk_pad = pl.pallas_call(
        functools.partial(rbm_cd_kernel, cd_steps=cd_steps),
        out_shape=jax.ShapeDtypeStruct((B_pad, nv), jnp.float32),
        grid_spec=pltpu.PrefetchScalarGridSpec(
            num_scalar_prefetch=0,
            grid=grid,
            in_specs=[
                pl.BlockSpec((TB, nv), lambda i: (i, 0)),              # v tile
                pl.BlockSpec((nv, nh), lambda i: (0, 0)),              # W (resident)
                pl.BlockSpec((nh, nv), lambda i: (0, 0)),              # W^T (resident)
                pl.BlockSpec((1, nv), lambda i: (0, 0)),               # bv
                pl.BlockSpec((1, nh), lambda i: (0, 0)),               # bh
                pl.BlockSpec((cd_steps, TB, nh), lambda i: (0, i, 0)), # noise for h
                pl.BlockSpec((cd_steps, TB, nv), lambda i: (0, i, 0)), # noise for v
            ],
            out_specs=pl.BlockSpec((TB, nv), lambda i: (i, 0)),
        ),
        compiler_params=pltpu.CompilerParams(
            dimension_semantics=("parallel",),   # megacore sharding on v7x
        ),
    )(v_f32, w_bf16, wt_bf16, bv2d, bh2d, uh, uv)

    return v, vk_pad[:B]


if __name__ == "__main__":
    # Small shapes consistent with the module (nv visible, nh hidden units).
    B, NV, NH = 8, 256, 128
    CD_STEPS = 1

    key = jax.random.PRNGKey(0)
    k_w, k_v = jax.random.split(key)

    # Parameter init mirroring __init__: W ~ N(0,1)*0.01, biases zero.
    W = jax.random.normal(k_w, (NV, NH), dtype=jnp.float32) * 0.01
    bv = jnp.zeros((NV,), dtype=jnp.float32)
    bh = jnp.zeros((NH,), dtype=jnp.float32)

    # Binary visible input (like binarized MNIST pixels).
    v = (jax.random.uniform(k_v, (B, NV)) > 0.5).astype(jnp.float32)

    v_out, vk = rbm_forward(v, W, bv, bh, seed=0, cd_steps=CD_STEPS)
    jax.block_until_ready((v_out, vk))

    assert v_out.shape == (B, NV) and vk.shape == (B, NV)
    assert bool(jnp.all((vk == 0.0) | (vk == 1.0)))  # bernoulli samples are {0,1}
    print("KERNEL_OK")
</pallas_src>

<mosaic_0001>
module attributes {stable_mosaic.version = 11 : i64} {
  func.func @rbm_cd_kernel(%arg0: i32, %arg1: memref<128x256xf32, #tpu.memory_space<vmem>>, %arg2: memref<256x128xbf16, #tpu.memory_space<vmem>>, %arg3: memref<128x256xbf16, #tpu.memory_space<vmem>>, %arg4: memref<1x256xf32, #tpu.memory_space<vmem>>, %arg5: memref<1x128xf32, #tpu.memory_space<vmem>>, %arg6: memref<1x128x128xf32, #tpu.memory_space<vmem>>, %arg7: memref<1x128x256xf32, #tpu.memory_space<vmem>>, %arg8: memref<128x256xf32, #tpu.memory_space<vmem>>) attributes {dimension_semantics = [#tpu.dimension_semantics<parallel>], iteration_bounds = array<i64: 1>, scalar_prefetch = 0 : i64, scratch_operands = 0 : i64, tpu.core_type = #tpu.core_type<tc>, window_params = [{transform_indices = @transform_0, window_bounds = array<i64: 128, 256>}, {pipeline_mode = #tpu.pipeline_mode<synchronous>, transform_indices = @transform_1, window_bounds = array<i64: 256, 128>}, {pipeline_mode = #tpu.pipeline_mode<synchronous>, transform_indices = @transform_2, window_bounds = array<i64: 128, 256>}, {pipeline_mode = #tpu.pipeline_mode<synchronous>, transform_indices = @transform_3, window_bounds = array<i64: 1, 256>}, {pipeline_mode = #tpu.pipeline_mode<synchronous>, transform_indices = @transform_4, window_bounds = array<i64: 1, 128>}, {transform_indices = @transform_5, window_bounds = array<i64: 1, 128, 128>}, {transform_indices = @transform_6, window_bounds = array<i64: 1, 128, 256>}, {transform_indices = @transform_7, window_bounds = array<i64: 128, 256>}]} {
    %c0 = arith.constant 0 : index
    %c0_0 = arith.constant 0 : index
    %0 = vector.load %arg2[%c0, %c0_0] : memref<256x128xbf16, #tpu.memory_space<vmem>>, vector<256x128xbf16>
    %c0_1 = arith.constant 0 : index
    %c0_2 = arith.constant 0 : index
    %1 = vector.load %arg3[%c0_1, %c0_2] : memref<128x256xbf16, #tpu.memory_space<vmem>>, vector<128x256xbf16>
    %c0_3 = arith.constant 0 : index
    %c0_4 = arith.constant 0 : index
    %2 = vector.load %arg5[%c0_3, %c0_4] : memref<1x128xf32, #tpu.memory_space<vmem>>, vector<1x128xf32>
    %3 = vector.shape_cast %2 : vector<1x128xf32> to vector<1x128xf32>
    %4 = vector.broadcast %3 : vector<1x128xf32> to vector<128x128xf32>
    %c0_5 = arith.constant 0 : index
    %c0_6 = arith.constant 0 : index
    %5 = vector.load %arg4[%c0_5, %c0_6] : memref<1x256xf32, #tpu.memory_space<vmem>>, vector<1x256xf32>
    %6 = vector.shape_cast %5 : vector<1x256xf32> to vector<1x256xf32>
    %7 = vector.broadcast %6 : vector<1x256xf32> to vector<128x256xf32>
    %c0_7 = arith.constant 0 : index
    %c0_8 = arith.constant 0 : index
    %8 = vector.load %arg1[%c0_7, %c0_8] : memref<128x256xf32, #tpu.memory_space<vmem>>, vector<128x256xf32>
    %9 = arith.truncf %8 : vector<128x256xf32> to vector<128x256xbf16>
    %cst = arith.constant dense<0.000000e+00> : vector<128x128xf32>
    %10 = tpu.matmul %9, %0, %cst {dimension_numbers = #tpu.dot_dimension_numbers<[1], [0], [0], [1], [0, 0, 1, 1], [], []>} : vector<128x256xbf16>, vector<256x128xbf16>, vector<128x128xf32> -> vector<128x128xf32>
    %11 = arith.addf %10, %4 : vector<128x128xf32>
    %12 = arith.negf %11 : vector<128x128xf32>
    %13 = math.exp %12 : vector<128x128xf32>
    %cst_9 = arith.constant 1.000000e+00 : f32
    %14 = vector.broadcast %cst_9 : f32 to vector<128x128xf32>
    %15 = arith.addf %14, %13 : vector<128x128xf32>
    %16 = arith.divf %14, %15 : vector<128x128xf32>
    %c0_10 = arith.constant 0 : index
    %c0_11 = arith.constant 0 : index
    %c0_12 = arith.constant 0 : index
    %17 = vector.load %arg6[%c0_10, %c0_11, %c0_12] : memref<1x128x128xf32, #tpu.memory_space<vmem>>, vector<1x128x128xf32>
    %18 = vector.shape_cast %17 : vector<1x128x128xf32> to vector<128x128xf32>
    %19 = arith.subf %16, %18 : vector<128x128xf32>
    %cst_13 = arith.constant 0.000000e+00 : f32
    %20 = vector.broadcast %cst_13 : f32 to vector<128x128xf32>
    %21 = arith.cmpf ogt, %19, %20 : vector<128x128xf32>
    %cst_14 = arith.constant 1.000000e+00 : f32
    %cst_15 = arith.constant 0.000000e+00 : f32
    %22 = vector.broadcast %cst_14 : f32 to vector<128x128xf32>
    %23 = vector.broadcast %cst_15 : f32 to vector<128x128xf32>
    %24 = arith.select %21, %22, %23 : vector<128x128xi1>, vector<128x128xf32>
    %25 = arith.truncf %24 : vector<128x128xf32> to vector<128x128xbf16>
    %cst_16 = arith.constant dense<0.000000e+00> : vector<128x256xf32>
    %26 = tpu.matmul %25, %1, %cst_16 {dimension_numbers = #tpu.dot_dimension_numbers<[1], [0], [0], [1], [0, 0, 1, 1], [], []>} : vector<128x128xbf16>, vector<128x256xbf16>, vector<128x256xf32> -> vector<128x256xf32>
    %27 = arith.addf %26, %7 : vector<128x256xf32>
    %28 = arith.negf %27 : vector<128x256xf32>
    %29 = math.exp %28 : vector<128x256xf32>
    %cst_17 = arith.constant 1.000000e+00 : f32
    %30 = vector.broadcast %cst_17 : f32 to vector<128x256xf32>
    %31 = arith.addf %30, %29 : vector<128x256xf32>
    %32 = arith.divf %30, %31 : vector<128x256xf32>
    %c0_18 = arith.constant 0 : index
    %c0_19 = arith.constant 0 : index
    %c0_20 = arith.constant 0 : index
    %33 = vector.load %arg7[%c0_18, %c0_19, %c0_20] : memref<1x128x256xf32, #tpu.memory_space<vmem>>, vector<1x128x256xf32>
    %34 = vector.shape_cast %33 : vector<1x128x256xf32> to vector<128x256xf32>
    %35 = arith.subf %32, %34 : vector<128x256xf32>
    %cst_21 = arith.constant 0.000000e+00 : f32
    %36 = vector.broadcast %cst_21 : f32 to vector<128x256xf32>
    %37 = arith.cmpf ogt, %35, %36 : vector<128x256xf32>
    %cst_22 = arith.constant 1.000000e+00 : f32
    %cst_23 = arith.constant 0.000000e+00 : f32
    %38 = vector.broadcast %cst_22 : f32 to vector<128x256xf32>
    %39 = vector.broadcast %cst_23 : f32 to vector<128x256xf32>
    %40 = arith.select %37, %38, %39 : vector<128x256xi1>, vector<128x256xf32>
    %c0_24 = arith.constant 0 : index
    %c0_25 = arith.constant 0 : index
    %41 = vector.load %arg8[%c0_24, %c0_25] : memref<128x256xf32, #tpu.memory_space<vmem>>, vector<128x256xf32>
    tpu.vector_store %arg8[%c0_24, %c0_25], %40 {strides = array<i32>} : memref<128x256xf32, #tpu.memory_space<vmem>>, vector<128x256xf32>,
    return
  }
  func.func @transform_0(%arg0: i32) -> (i32, i32) {
    %c0_i32 = arith.constant 0 : i32
    %c0_i32_0 = arith.constant 0 : i32
    return %arg0, %c0_i32 : i32, i32
  }
  func.func @transform_1(%arg0: i32) -> (i32, i32) {
    %c0_i32 = arith.constant 0 : i32
    %c0_i32_0 = arith.constant 0 : i32
    %c0_i32_1 = arith.constant 0 : i32
    return %c0_i32, %c0_i32_0 : i32, i32
  }
  func.func @transform_2(%arg0: i32) -> (i32, i32) {
    %c0_i32 = arith.constant 0 : i32
    %c0_i32_0 = arith.constant 0 : i32
    %c0_i32_1 = arith.constant 0 : i32
    return %c0_i32, %c0_i32_0 : i32, i32
  }
  func.func @transform_3(%arg0: i32) -> (i32, i32) {
    %c0_i32 = arith.constant 0 : i32
    %c0_i32_0 = arith.constant 0 : i32
    %c0_i32_1 = arith.constant 0 : i32
    return %c0_i32, %c0_i32_0 : i32, i32
  }
  func.func @transform_4(%arg0: i32) -> (i32, i32) {
    %c0_i32 = arith.constant 0 : i32
    %c0_i32_0 = arith.constant 0 : i32
    %c0_i32_1 = arith.constant 0 : i32
    return %c0_i32, %c0_i32_0 : i32, i32
  }
  func.func @transform_5(%arg0: i32) -> (i32, i32, i32) {
    %c0_i32 = arith.constant 0 : i32
    %c0_i32_0 = arith.constant 0 : i32
    %c0_i32_1 = arith.constant 0 : i32
    return %c0_i32, %arg0, %c0_i32_0 : i32, i32, i32
  }
  func.func @transform_6(%arg0: i32) -> (i32, i32, i32) {
    %c0_i32 = arith.constant 0 : i32
    %c0_i32_0 = arith.constant 0 : i32
    %c0_i32_1 = arith.constant 0 : i32
    return %c0_i32, %arg0, %c0_i32_0 : i32, i32, i32
  }
  func.func @transform_7(%arg0: i32) -> (i32, i32) {
    %c0_i32 = arith.constant 0 : i32
    %c0_i32_0 = arith.constant 0 : i32
    return %arg0, %c0_i32 : i32, i32
  }
}

</mosaic_0001>

<bundles_post_ra>
// kernel: tpu_custom_call.1
= control target key start
LH: loop header
LB: loop body
LE: loop exit
PB: predicated region body
PF: predicated region fallthrough
CT: control target
= control target key end

     0   :  { %12 = vsyncpa [#allocation3], 0  ;;  %s1862_s0 = inlined_call_operand.hbm [shape: f32[128,256], index: 0, kind: input, shape index: {}]   ;;  %s1863_s1 = inlined_call_operand.hbm [shape: bf16[256,128], index: 1, kind: input, shape index: {}]   ;;  %s1864_s2 = inlined_call_operand.hbm [shape: bf16[128,256], index: 2, kind: input, shape index: {}]   ;;  %s1865_s3 = inlined_call_operand.vmem [shape: f32[1,256], index: 3, kind: input, shape index: {}]   ;;  %s1866_s4 = inlined_call_operand.vmem [shape: f32[1,128], index: 4, kind: input, shape index: {}]   ;;  %s1867_s5 = inlined_call_operand.hbm [shape: f32[1,128,128], index: 5, kind: input, shape index: {}]   ;;  %s1868_s6 = inlined_call_operand.hbm [shape: f32[1,128,256], index: 6, kind: input, shape index: {}]   ;;  %s1869_s7 = inlined_call_operand.hbm [shape: f32[128,256], index: 7, kind: output, shape index: {}]  }
   0x1   :  { %13 = vsyncpa [#allocation6], 0 }
   0x2   :  { %14 = vsyncpa [#allocation9], 0 }
   0x3   :  { %15 = vsyncpa [#allocation4], 0  ;;  %s1672_s24 = smov [#allocation5]  }
   0x4   :  { %s33_s25 = sshll.u32 %s1672_s24, 4  ;;  %s34_s25 = int_to_ptr.vmem [resolvable:$true] %s33_s25 }
   0x5   :  { %s1552_s26 = scalar_lea.vmem %s34_s25, 2048  ;;  %p1557_p1 = scmp.lt.s32.totalorder %s34_s25, %s34_s25 }
   0x6   :  { %p1553_p0 = scmp.ne.s32.totalorder %s34_s25, %s1552_s26  ;;  %p1558_p2 = scmp.lt.s32.totalorder %s1552_s26, %s1552_s26 }
   0x8   :  { %p1559_p3 = por %p1558_p2, %p1557_p1 }
   0xa   :  { %p1560_p4 = pnand %p1559_p3, %p1553_p0 }
   0xc   :  { %1563 = shalt.err (!%p1560_p4)
}
   0xd   :  { %s1673_s27 = smov 64   ;;  %s1674_s28 = smov 4  }
   0xe   :  { %39 = dma.hbm_to_vmem [thread:$0]  %s1863_s1, 2048, %s34_s25, [#allocation6], %s1673_s27, %s1673_s27, %s1674_s28  }
   0xf   :  { %s1675_s8 = smov [#allocation8]   ;;  %s1676_s10 = smov [#allocation2]  }
  0x10   :  { %s61_s9 = sshll.u32 %s1675_s8, 4  ;;  %s21_s11 = sshll.u32 %s1676_s10, 4  ;;  %s62_s9 = int_to_ptr.vmem [resolvable:$true] %s61_s9  ;;  %s22_s11 = int_to_ptr.vmem [resolvable:$true] %s21_s11 }
  0x11   :  { %s1572_s12 = scalar_lea.vmem %s62_s9, 2048  ;;  %p1577_p6 = scmp.lt.s32.totalorder %s62_s9, %s62_s9 }
  0x12   :  { %p1573_p5 = scmp.ne.s32.totalorder %s62_s9, %s1572_s12  ;;  %p1578_p7 = scmp.lt.s32.totalorder %s1572_s12, %s1572_s12 }
  0x14   :  { %p1579_p8 = por %p1578_p7, %p1577_p6 }
  0x16   :  { %p1580_p9 = pnand %p1579_p8, %p1573_p5 }
  0x18   :  { %1583 = shalt.err (!%p1580_p9)
}
  0x19   :  { %s1677_s13 = smov 128   ;;  %s1678_s14 = smov 8  }
  0x1a   :  { %67 = dma.hbm_to_vmem [thread:$0]  %s1867_s5, 2048, %s62_s9, [#allocation9], %s1677_s13, %s1677_s13, %s1678_s14  }
  0x1b   :  { %s1592_s1 = scalar_lea.vmem %s22_s11, 4096  ;;  %p1597_p11 = scmp.lt.s32.totalorder %s22_s11, %s22_s11 }
  0x1c   :  { %p1593_p10 = scmp.ne.s32.totalorder %s22_s11, %s1592_s1  ;;  %p1598_p12 = scmp.lt.s32.totalorder %s1592_s1, %s1592_s1 }
  0x1e   :  { %p1599_p13 = por %p1598_p12, %p1597_p11 }
  0x20   :  { %p1600_p0 = pnand %p1599_p13, %p1593_p10 }
  0x22   :  { %1603 = shalt.err (!%p1600_p0)
}
  0x23   :  { %s1679_s17 = smov 256   ;;  %s1680_s18 = smov 16  }
  0x24   :  { %27 = dma.hbm_to_vmem [thread:$0]  %s1862_s0, 4096, %s22_s11, [#allocation3], %s1679_s17, %s1679_s17, %s1680_s18  }
  0x25   :  { %s1681_s21 = smov [#allocation7]   ;;  %s1682_s5 = smov [#allocation10]  }
  0x26   :  { %s45_s22 = sshll.u32 %s1681_s21, 4  ;;  %s73_s23 = sshll.u32 %s1682_s5, 4  ;;  %s46_s22 = int_to_ptr.vmem [resolvable:$true] %s45_s22  ;;  %s74_s23 = int_to_ptr.vmem [resolvable:$true] %s73_s23 }
  0x27   :  { %s1612_s24 = scalar_lea.vmem %s46_s22, 2048  ;;  %p1617_p2 = scmp.lt.s32.totalorder %s46_s22, %s46_s22 }
  0x28   :  { %p1613_p1 = scmp.ne.s32.totalorder %s46_s22, %s1612_s24  ;;  %p1618_p3 = scmp.lt.s32.totalorder %s1612_s24, %s1612_s24 }
  0x2a   :  { %p1619_p4 = por %p1618_p3, %p1617_p2 }
  0x2c   :  { %p1620_p5 = pnand %p1619_p4, %p1613_p1 }
  0x2e   :  { %1623 = shalt.err (!%p1620_p5)
}
  0x2f   :  { %51 = dma.hbm_to_vmem [thread:$0]  %s1864_s2, 2048, %s46_s22, [#allocation6], %s1677_s13, %s1677_s13, %s1678_s14  }
  0x30   :  { %s1632_s27 = scalar_lea.vmem %s74_s23, 4096  ;;  %p1637_p7 = scmp.lt.s32.totalorder %s74_s23, %s74_s23 }
  0x31   :  { %p1633_p6 = scmp.ne.s32.totalorder %s74_s23, %s1632_s27  ;;  %p1638_p8 = scmp.lt.s32.totalorder %s1632_s27, %s1632_s27 }
  0x33   :  { %p1639_p9 = por %p1638_p8, %p1637_p7 }
  0x35   :  { %p1640_p10 = pnand %p1639_p9, %p1633_p6 }
  0x37   :  { %1643 = shalt.err (!%p1640_p10)
}
  0x38   :  { %79 = dma.hbm_to_vmem [thread:$0]  %s1868_s6, 4096, %s74_s23, [#allocation9], %s1679_s17, %s1679_s17, %s1680_s18  }
  0x39   :  { %1664 = dma.done.wait [#allocation3], 4096  }
  0x3a   :  { %1665 = vsyncadd [#allocation3], 4294963200 }
  0x3b   :  { %1666 = dma.done.wait [#allocation6], 4096  }
  0x3c   :  { %1667 = vsyncadd [#allocation6], 4294963200 }
  0x3d   :  { %1668 = dma.done.wait [#allocation9], 6144  }
  0x3e   :  { %1669 = vsyncadd [#allocation9], 4294961152  ;;  %v1312_v0 = vld [vmem:[#allocation5 + $0x78] sm:$0xff]   ;;  %v1314_v2 = vld [vmem:[#allocation5 + $0x70] sm:$0xff]  }
  0x3f   :  { %v1313_v1 = vld [vmem:[#allocation5 + $0x38] sm:$0xff]   ;;  %1233 = vmatprep.subr.bf16.mxu0 %v1312_v0  ;;  %v1315_v3 = vld [vmem:[#allocation5 + $0x30] sm:$0xff]   ;;  %v1316_v4 = vld [vmem:[#allocation5 + $0x68] sm:$0xff]  }
  0x40   :  { %1234 = vmatpush3.bf16.msra.mxu0 %v1313_v1  ;;  %v1317_v5 = vld [vmem:[#allocation5 + $0x28] sm:$0xff]   ;;  %v1318_v6 = vld [vmem:[#allocation5 + $0x60] sm:$0xff]   ;;  %v1320_v8 = vld [vmem:[#allocation5 + $0x58] sm:$0xff]  }
  0x41   :  { %1235 = vmatprep.subr.bf16.mxu0 %v1314_v2  ;;  %v1319_v7 = vld [vmem:[#allocation5 + $0x20] sm:$0xff]   ;;  %v1321_v9 = vld [vmem:[#allocation5 + $0x18] sm:$0xff]   ;;  %v1322_v10 = vld [vmem:[#allocation5 + $0x50] sm:$0xff]  }
  0x42   :  { %v164_v11 = vld [vmem:[#allocation2 + $0x8] sm:$0xff]  ;;  %v166_v12 = vld [vmem:[#allocation2 + $0x18] sm:$0xff]  ;;  %v1323_v14 = vld [vmem:[#allocation5 + $0x10] sm:$0xff]  }
  0x43   :  { %v196_v13 = vpack.c.bf16 %v166_v12, %v164_v11  ;;  %v1324_v15 = vld [vmem:[#allocation5 + $0x48] sm:$0xff]   ;;  %v1326_v17 = vld [vmem:[#allocation5 + $0x40] sm:$0xff]   ;;  %v165_v20 = vld [vmem:[#allocation2 + $0x10] sm:$0xff] }
  0x44   :  { %1236 = vmatpush3.bf16.msra.mxu0 %v1315_v3  ;;  %v1325_v16 = vld [vmem:[#allocation5 + $0x8] sm:$0xff]   ;;  %v1327_v18 = vld [vmem:[#allocation5] sm:$0xff]   ;;  %v170_v22 = vld [vmem:[#allocation2 + $0x38] sm:$0xff] }
  0x45   :  { %1237 = vmatprep.subr.bf16.mxu0 %v1316_v4  ;;  %339 = vmatprep.mubr.bf16.mxu0 %v196_v13  ;;  %v163_v19 = vld [vmem:[#allocation2] sm:$0xff]  ;;  %v168_v21 = vld [vmem:[#allocation2 + $0x28] sm:$0xff]  ;;  %v169_v26 = vld [vmem:[#allocation2 + $0x30] sm:$0xff] }
  0x46   :  { %v195_v23 = vpack.c.bf16 %v165_v20, %v163_v19  ;;  %v198_v24 = vpack.c.bf16 %v170_v22, %v168_v21  ;;  %v167_v25 = vld [vmem:[#allocation2 + $0x20] sm:$0xff]  ;;  %v172_v27 = vld [vmem:[#allocation2 + $0x48] sm:$0xff]  ;;  %v174_v28 = vld [vmem:[#allocation2 + $0x58] sm:$0xff] }
  0x47   :  { %v197_v29 = vpack.c.bf16 %v169_v26, %v167_v25  ;;  %v200_v30 = vpack.c.bf16 %v174_v28, %v172_v27  ;;  %v171_v31 = vld [vmem:[#allocation2 + $0x40] sm:$0xff]  ;;  %v173_v32 = vld [vmem:[#allocation2 + $0x50] sm:$0xff]  ;;  %v176_v33 = vld [vmem:[#allocation2 + $0x68] sm:$0xff] }
  0x48   :  { %1238 = vmatpush3.bf16.msra.mxu0 %v1317_v5  ;;  %v178_v34 = vld [vmem:[#allocation2 + $0x78] sm:$0xff]  ;;  %v199_v35 = vpack.c.bf16 %v173_v32, %v171_v31  ;;  %v175_v37 = vld [vmem:[#allocation2 + $0x60] sm:$0xff]  ;;  %v177_v38 = vld [vmem:[#allocation2 + $0x70] sm:$0xff] }
  0x49   :  { %1239 = vmatprep.subr.bf16.mxu0 %v1318_v6  ;;  %v202_v36 = vpack.c.bf16 %v178_v34, %v176_v33  ;;  %v180_v39 = vld [vmem:[#allocation2 + $0x88] sm:$0xff]  ;;  %v182_v40 = vld [vmem:[#allocation2 + $0x98] sm:$0xff]  ;;  %v201_v41 = vpack.c.bf16 %v177_v38, %v175_v37  ;;  %v179_v43 = vld [vmem:[#allocation2 + $0x80] sm:$0xff] }
  0x4a   :  { %v204_v42 = vpack.c.bf16 %v182_v40, %v180_v39  ;;  %v181_v44 = vld [vmem:[#allocation2 + $0x90] sm:$0xff]  ;;  %v184_v45 = vld [vmem:[#allocation2 + $0xa8] sm:$0xff]  ;;  %v186_v46 = vld [vmem:[#allocation2 + $0xb8] sm:$0xff] }
  0x4b   :  { %v203_v47 = vpack.c.bf16 %v181_v44, %v179_v43  ;;  %v206_v48 = vpack.c.bf16 %v186_v46, %v184_v45  ;;  %v183_v49 = vld [vmem:[#allocation2 + $0xa0] sm:$0xff]  ;;  %v185_v50 = vld [vmem:[#allocation2 + $0xb0] sm:$0xff]  ;;  %v188_v51 = vld [vmem:[#allocation2 + $0xc8] sm:$0xff] }
  0x4c   :  { %1240 = vmatpush3.bf16.msra.mxu0 %v1319_v7  ;;  %v190_v52 = vld [vmem:[#allocation2 + $0xd8] sm:$0xff]  ;;  %v205_v53 = vpack.c.bf16 %v185_v50, %v183_v49  ;;  %v187_v55 = vld [vmem:[#allocation2 + $0xc0] sm:$0xff]  ;;  %v189_v56 = vld [vmem:[#allocation2 + $0xd0] sm:$0xff] }
  0x4d   :  { %1241 = vmatprep.subr.bf16.mxu0 %v1320_v8  ;;  %v208_v54 = vpack.c.bf16 %v190_v52, %v188_v51  ;;  %v192_v57 = vld [vmem:[#allocation2 + $0xe8] sm:$0xff]  ;;  %v194_v58 = vld [vmem:[#allocation2 + $0xf8] sm:$0xff]  ;;  %v207_v59 = vpack.c.bf16 %v189_v56, %v187_v55  ;;  %v191_v61 = vld [vmem:[#allocation2 + $0xe0] sm:$0xff] }
  0x4e   :  { %v210_v60 = vpack.c.bf16 %v194_v58, %v192_v57  ;;  %v193_v62 = vld [vmem:[#allocation2 + $0xf0] sm:$0xff]  ;;  %v1331_v2 = vld [vmem:[#allocation7 + $0x64] ss:$8 sps:$4 sm:$0xff]   ;;  %v1333_v3 = vld [vmem:[#allocation7 + $0x60] ss:$8 sps:$4 sm:$0xff]  }
  0x4f   :  { %v209_v63 = vpack.c.bf16 %v193_v62, %v191_v61  ;;  %v1328_v0 = vld [vmem:[#allocation7 + $0x74] ss:$8 sps:$4 sm:$0xff]   ;;  %v1330_v1 = vld [vmem:[#allocation7 + $0x70] ss:$8 sps:$4 sm:$0xff]   ;;  %v1337_v6 = vld [vmem:[#allocation7 + $0x44] ss:$8 sps:$4 sm:$0xff]  }
  0x50   :  { %1242 = vmatpush3.bf16.msra.mxu0 %v1321_v9  ;;  %652 = vmatprep.subr.bf16.mxu1 %v1328_v0  ;;  %v1334_v4 = vld [vmem:[#allocation7 + $0x54] ss:$8 sps:$4 sm:$0xff]   ;;  %v1336_v5 = vld [vmem:[#allocation7 + $0x50] ss:$8 sps:$4 sm:$0xff]   ;;  %v1339_v7 = vld [vmem:[#allocation7 + $0x40] ss:$8 sps:$4 sm:$0xff]  }
  0x51   :  { %1243 = vmatprep.subr.bf16.mxu0 %v1322_v10  ;;  %653 = vmatpush1.bf16.msra.mxu1 %v1330_v1  ;;  %v1340_v8 = vld [vmem:[#allocation7 + $0x34] ss:$8 sps:$4 sm:$0xff]   ;;  %v1342_v9 = vld [vmem:[#allocation7 + $0x30] ss:$8 sps:$4 sm:$0xff]   ;;  %v1343_v10 = vld [vmem:[#allocation7 + $0x24] ss:$8 sps:$4 sm:$0xff]  }
  0x52   :  { %654 = vmatprep.subr.bf16.mxu1 %v1331_v2  ;;  %v1345_v11 = vld [vmem:[#allocation7 + $0x20] ss:$8 sps:$4 sm:$0xff]   ;;  %v1346_v12 = vld [vmem:[#allocation7 + $0x14] ss:$8 sps:$4 sm:$0xff]   ;;  %v1348_v13 = vld [vmem:[#allocation7 + $0x10] ss:$8 sps:$4 sm:$0xff]  }
  0x54   :  { %1244 = vmatpush3.bf16.msra.mxu0 %v1323_v14  ;;  %v1349_v14 = vld [vmem:[#allocation7 + $0x4] ss:$8 sps:$4 sm:$0xff]  }
  0x55   :  { %1245 = vmatprep.subr.bf16.mxu0 %v1324_v15  ;;  %655 = vmatpush1.bf16.msra.mxu1 %v1333_v3  ;;  %v1351_v15 = vld [vmem:[#allocation7] ss:$8 sps:$4 sm:$0xff]  }
  0x56   :  { %656 = vmatprep.subr.bf16.mxu1 %v1334_v4 }
  0x58   :  { %1246 = vmatpush3.bf16.msra.mxu0 %v1325_v16  ;;  %v1683_v16 = vmov 0  }
  0x59   :  { %1247 = vmatprep.subr.bf16.mxu0 %v1326_v17  ;;  %657 = vmatpush1.bf16.msra.mxu1 %v1336_v5 }
  0x5a   :  { %658 = vmatprep.subr.bf16.mxu1 %v1337_v6  ;;  %684 = vmatprep.mubr.bf16.mxu1 %v1683_v16 }
  0x5c   :  { %1248 = vmatpush3.bf16.msra.mxu0 %v1327_v18  ;;  %v1752_v18 = vld [vmem:[%s1866_s4] ss:$0 sm:$0xff] }
  0x5d   :  { %659 = vmatpush1.bf16.msra.mxu1 %v1339_v7 }
  0x5e   :  { %660 = vmatprep.subr.bf16.mxu1 %v1340_v8 }
  0x5f   :  { %340 = vmatmul.mubr.bf16.vlgmr.msra.gmra.mxu0 %v195_v23 }
  0x60   :  { %347 = vmatprep.mubr.bf16.mxu0 %v198_v24 }
  0x61   :  { %661 = vmatpush1.bf16.msra.mxu1 %v1342_v9  ;;  %v500_v9 = vld [vmem:[#allocation8] sm:$0xff] }
  0x62   :  { %662 = vmatprep.subr.bf16.mxu1 %v1343_v10 }
  0x65   :  { %663 = vmatpush1.bf16.msra.mxu1 %v1345_v11 }
  0x66   :  { %664 = vmatprep.subr.bf16.mxu1 %v1346_v12 }
  0x67   :  { %348 = vmatmul.mubr.bf16.gmra.mxu0 %v197_v29 }
  0x68   :  { %355 = vmatprep.mubr.bf16.mxu0 %v200_v30 }
  0x69   :  { %665 = vmatpush1.bf16.msra.mxu1 %v1348_v13 }
  0x6a   :  { %666 = vmatprep.subr.bf16.mxu1 %v1349_v14 }
  0x6d   :  { %667 = vmatpush1.bf16.msra.mxu1 %v1351_v15  ;;  %v501_v15 = vld [vmem:[#allocation8 + $0x8] sm:$0xff] }
  0x6f   :  { %356 = vmatmul.mubr.bf16.gmra.mxu0 %v199_v35 }
  0x70   :  { %363 = vmatprep.mubr.bf16.mxu0 %v202_v36 }
  0x77   :  { %364 = vmatmul.mubr.bf16.gmra.mxu0 %v201_v41 }
  0x78   :  { %371 = vmatprep.mubr.bf16.mxu0 %v204_v42 }
  0x7f   :  { %372 = vmatmul.mubr.bf16.gmra.mxu0 %v203_v47 }
  0x80   :  { %379 = vmatprep.mubr.bf16.mxu0 %v206_v48 }
  0x87   :  { %380 = vmatmul.mubr.bf16.gmra.mxu0 %v205_v53 }
  0x88   :  { %387 = vmatprep.mubr.bf16.mxu0 %v208_v54 }
  0x8f   :  { %388 = vmatmul.mubr.bf16.gmra.mxu0 %v207_v59 }
  0x90   :  { %395 = vmatprep.mubr.bf16.mxu0 %v210_v60 }
  0x97   :  { %396 = vmatmul.mubr.bf16.gmra.mxu0 %v209_v63 }
 0x11f   :  { %v1249_v17 = vpop.f32.mrf.mxu0 }
 0x121   :  { %v1250_v19 = vpop.f32.mrf.mxu0 }
 0x122   :  { %v1251_v20 = vadd.f32 %v1250_v19, %v1249_v17 }
 0x123   :  { %v1252_v21 = vpop.f32.mrf.mxu0 }
 0x124   :  { %v342_v22 = vadd.f32 %v1251_v20, %v1752_v18 }
 0x125   :  { %v1253_v23 = vpop.f32.mrf.mxu0 }
 0x126   :  { %v1153_v24 = vmul.f32 -1.442695, %v342_v22  ;;  %v1254_v25 = vadd.f32 %v1253_v23, %v1252_v21 }
 0x127   :  { %v1255_v26 = vpop.f32.mrf.mxu0 }
 0x128   :  { %1352 = vpow2.f32 %v1153_v24  ;;  %v345_v27 = vadd.f32 %v1254_v25, %v1752_v18 }
 0x129   :  { %v1256_v28 = vpop.f32.mrf.mxu0 }
 0x12a   :  { %v1154_v29 = vmul.f32 -1.442695, %v345_v27  ;;  %v1257_v30 = vadd.f32 %v1256_v28, %v1255_v26 }
 0x12b   :  { %v1258_v31 = vpop.f32.mrf.mxu0 }
 0x12c   :  { %1354 = vpow2.f32 %v1154_v29  ;;  %v350_v32 = vadd.f32 %v1257_v30, %v1752_v18 }
 0x12d   :  { %v1259_v33 = vpop.f32.mrf.mxu0 }
 0x12e   :  { %v1155_v34 = vmul.f32 -1.442695, %v350_v32  ;;  %v1260_v35 = vadd.f32 %v1259_v33, %v1258_v31  ;;  %v502_v31 = vld [vmem:[#allocation8 + $0x10] sm:$0xff] }
 0x12f   :  { %v1261_v36 = vpop.f32.mrf.mxu0 }
 0x130   :  { %1356 = vpow2.f32 %v1155_v34  ;;  %v353_v37 = vadd.f32 %v1260_v35, %v1752_v18  ;;  %v1684_v35 = vmov 1.0|1.0  }
 0x131   :  { %v1262_v38 = vpop.f32.mrf.mxu0 }
 0x132   :  { %v1156_v39 = vmul.f32 -1.442695, %v353_v37  ;;  %v1263_v40 = vadd.f32 %v1262_v38, %v1261_v36  ;;  %v503_v38 = vld [vmem:[#allocation8 + $0x18] sm:$0xff] }
 0x133   :  { %v1264_v41 = vpop.f32.mrf.mxu0 }
 0x134   :  { %1358 = vpow2.f32 %v1156_v39  ;;  %v358_v42 = vadd.f32 %v1263_v40, %v1752_v18 }
 0x135   :  { %v1353_v43 = vpop.eup %1352  ;;  %v1265_v44 = vpop.f32.mrf.mxu0 }
 0x136   :  { %v452_v45 = vadd.f32 1.0, %v1353_v43  ;;  %v1157_v46 = vmul.f32 -1.442695, %v358_v42  ;;  %v1266_v47 = vadd.f32 %v1265_v44, %v1264_v41 }
 0x137   :  { %v1267_v48 = vpop.f32.mrf.mxu0 }
 0x138   :  { %1360 = vrcp.f32 %v452_v45  ;;  %v361_v49 = vadd.f32 %v1266_v47, %v1752_v18 }
 0x139   :  { %v1355_v50 = vpop.eup %1354  ;;  %1362 = vpow2.f32 %v1157_v46  ;;  %v1268_v51 = vpop.f32.mrf.mxu0 }
 0x13a   :  { %v453_v52 = vadd.f32 1.0, %v1355_v50  ;;  %v1158_v53 = vmul.f32 -1.442695, %v361_v49  ;;  %v1269_v54 = vadd.f32 %v1268_v51, %v1267_v48 }
 0x13b   :  { %v1270_v55 = vpop.f32.mrf.mxu0 }
 0x13c   :  { %1364 = vrcp.f32 %v453_v52  ;;  %v366_v56 = vadd.f32 %v1269_v54, %v1752_v18 }
 0x13d   :  { %v1357_v57 = vpop.eup %1356  ;;  %1366 = vpow2.f32 %v1158_v53  ;;  %v1271_v58 = vpop.f32.mrf.mxu0 }
 0x13e   :  { %v454_v59 = vadd.f32 1.0, %v1357_v57  ;;  %v1159_v60 = vmul.f32 -1.442695, %v366_v56  ;;  %v1272_v61 = vadd.f32 %v1271_v58, %v1270_v55  ;;  %v504_v56 = vld [vmem:[#allocation8 + $0x20] sm:$0xff] }
 0x13f   :  { %v1273_v62 = vpop.f32.mrf.mxu0 }
 0x140   :  { %1368 = vrcp.f32 %v454_v59  ;;  %v369_v63 = vadd.f32 %v1272_v61, %v1752_v18  ;;  %v505_v59 = vld [vmem:[#allocation8 + $0x28] sm:$0xff] }
 0x141   :  { %v1359_v0 = vpop.eup %1358  ;;  %1370 = vpow2.f32 %v1159_v60  ;;  %v1274_v1 = vpop.f32.mrf.mxu0 }
 0x142   :  { %v455_v2 = vadd.f32 1.0, %v1359_v0  ;;  %v1160_v3 = vmul.f32 -1.442695, %v369_v63  ;;  %v1275_v4 = vadd.f32 %v1274_v1, %v1273_v62 }
 0x143   :  { %v1276_v5 = vpop.f32.mrf.mxu0 }
 0x144   :  { %1372 = vrcp.f32 %v455_v2  ;;  %v374_v6 = vadd.f32 %v1275_v4, %v1752_v18 }
 0x145   :  { %v1361_v7 = vpop.eup %1360  ;;  %1374 = vpow2.f32 %v1160_v3  ;;  %v1277_v8 = vpop.f32.mrf.mxu0 }
 0x146   :  { %v1363_v10 = vpop.eup %1362  ;;  %v1161_v11 = vmul.f32 -1.442695, %v374_v6  ;;  %v1278_v12 = vadd.f32 %v1277_v8, %v1276_v5  ;;  %v516_v19 = vsub.f32 %v1361_v7, %v500_v9 }
 0x147   :  { %v456_v13 = vadd.f32 1.0, %v1363_v10  ;;  %v1279_v14 = vpop.f32.mrf.mxu0 }
 0x148   :  { %1376 = vpow2.f32 %v1161_v11  ;;  %v377_v17 = vadd.f32 %v1278_v12, %v1752_v18  ;;  %vm532_vm0 = vcmp.gt.f32.partialorder %v516_v19, 0.0  ;;  %v506_v12 = vld [vmem:[#allocation8 + $0x30] sm:$0xff] }
 0x149   :  { %v1365_v20 = vpop.eup %1364  ;;  %1378 = vrcp.f32 %v456_v13  ;;  %v1280_v21 = vpop.f32.mrf.mxu0 }
 0x14a   :  { %v1367_v22 = vpop.eup %1366  ;;  %v1162_v23 = vmul.f32 -1.442695, %v377_v17  ;;  %v1281_v24 = vadd.f32 %v1280_v21, %v1279_v14  ;;  %v517_v25 = vsub.f32 %v1365_v20, %v501_v15  ;;  %v507_v14 = vld [vmem:[#allocation8 + $0x38] sm:$0xff] }
 0x14b   :  { %v457_v26 = vadd.f32 1.0, %v1367_v22  ;;  %v1282_v27 = vpop.f32.mrf.mxu0 }
 0x14c   :  { %1380 = vpow2.f32 %v1162_v23  ;;  %v382_v28 = vadd.f32 %v1281_v24, %v1752_v18  ;;  %vm533_vm1 = vcmp.gt.f32.partialorder %v517_v25, 0.0  ;;  %v508_v24 = vld [vmem:[#allocation8 + $0x40] sm:$0xff] }
 0x14d   :  { %v1369_v29 = vpop.eup %1368  ;;  %1382 = vrcp.f32 %v457_v26  ;;  %v1283_v30 = vpop.f32.mrf.mxu0  ;;  %vm1185_vm2 = vmpackc.low %vm533_vm1, %vm532_vm0 }
 0x14e   :  { %v1371_v32 = vpop.eup %1370  ;;  %v1163_v33 = vmul.f32 -1.442695, %v382_v28  ;;  %v1284_v34 = vadd.f32 %v1283_v30, %v1282_v27  ;;  %1186 = vmatmul.mubr.msk.bf16.vlgmr.msra.gmra.mxu1 %vm1185_vm2, %v1684_v35  ;;  %v518_v40 = vsub.f32 %v1369_v29, %v502_v31 }
 0x14f   :  { %v458_v36 = vadd.f32 1.0, %v1371_v32  ;;  %v1285_v37 = vpop.f32.mrf.mxu0  ;;  %694 = vmatprep.mubr.bf16.mxu1 %v1683_v16 }
 0x150   :  { %1384 = vpow2.f32 %v1163_v33  ;;  %v385_v39 = vadd.f32 %v1284_v34, %v1752_v18  ;;  %vm534_vm3 = vcmp.gt.f32.partialorder %v518_v40, 0.0  ;;  %v510_v33 = vld [vmem:[#allocation8 + $0x50] sm:$0xff] }
 0x151   :  { %v1373_v41 = vpop.eup %1372  ;;  %1386 = vrcp.f32 %v458_v36  ;;  %v1286_v42 = vpop.f32.mrf.mxu0 }
 0x152   :  { %v1375_v43 = vpop.eup %1374  ;;  %v1164_v44 = vmul.f32 -1.442695, %v385_v39  ;;  %v1287_v45 = vadd.f32 %v1286_v42, %v1285_v37  ;;  %v519_v46 = vsub.f32 %v1373_v41, %v503_v38  ;;  %v511_v37 = vld [vmem:[#allocation8 + $0x58] sm:$0xff] }
 0x153   :  { %v459_v47 = vadd.f32 1.0, %v1375_v43  ;;  %v1288_v48 = vpop.f32.mrf.mxu0 }
 0x154   :  { %1388 = vpow2.f32 %v1164_v44  ;;  %v390_v49 = vadd.f32 %v1287_v45, %v1752_v18  ;;  %vm535_vm4 = vcmp.gt.f32.partialorder %v519_v46, 0.0  ;;  %v512_v44 = vld [vmem:[#allocation8 + $0x60] sm:$0xff]  ;;  %v513_v45 = vld [vmem:[#allocation8 + $0x68] sm:$0xff] }
 0x155   :  { %v1377_v50 = vpop.eup %1376  ;;  %1390 = vrcp.f32 %v459_v47  ;;  %v1289_v51 = vpop.f32.mrf.mxu0  ;;  %vm1187_vm5 = vmpackc.low %vm535_vm4, %vm534_vm3 }
 0x156   :  { %v1379_v52 = vpop.eup %1378  ;;  %v460_v53 = vadd.f32 1.0, %v1377_v50  ;;  %v1165_v54 = vmul.f32 -1.442695, %v390_v49  ;;  %v1290_v55 = vadd.f32 %v1289_v51, %v1288_v48  ;;  %1188 = vmatmul.mubr.msk.bf16.gmra.mxu1 %vm1187_vm5, %v1684_v35  ;;  %v514_v50 = vld [vmem:[#allocation8 + $0x70] sm:$0xff]  ;;  %v515_v51 = vld [vmem:[#allocation8 + $0x78] sm:$0xff] }
 0x157   :  { %v1291_v57 = vpop.f32.mrf.mxu0  ;;  %704 = vmatprep.mubr.bf16.mxu1 %v1683_v16  ;;  %v520_v62 = vsub.f32 %v1379_v52, %v504_v56 }
 0x158   :  { %1392 = vrcp.f32 %v460_v53  ;;  %v393_v58 = vadd.f32 %v1290_v55, %v1752_v18  ;;  %v153_v55 = vlaneseq }
 0x159   :  { %v1381_v60 = vpop.eup %1380  ;;  %1394 = vpow2.f32 %v1165_v54  ;;  %v1292_v61 = vpop.f32.mrf.mxu0  ;;  %vm536_vm6 = vcmp.gt.f32.partialorder %v520_v62, 0.0 }
 0x15a   :  { %v1383_v63 = vpop.eup %1382  ;;  %v461_v0 = vadd.f32 1.0, %v1381_v60  ;;  %v1166_v1 = vmul.f32 -1.442695, %v393_v58  ;;  %v1293_v2 = vadd.f32 %v1292_v61, %v1291_v57  ;;  %v154_v56 = vshrl.u32 %v153_v55, 7  ;;  %v151_v58 = vld [vmem:[%s1865_s3] sm:$0x3] }
 0x15b   :  { %v1294_v3 = vpop.f32.mrf.mxu0  ;;  %v521_v4 = vsub.f32 %v1383_v63, %v505_v59  ;;  %s1686_s3 = smov [#allocation11]  }
 0x15c   :  { %1396 = vrcp.f32 %v461_v0  ;;  %v398_v5 = vadd.f32 %v1293_v2, %v1752_v18  ;;  %v155_v57 = vsub.s32 0, %v154_v56  ;;  %v159_v59 = vsub.s32 1, %v154_v56  ;;  %s1122_s30 = sshll.u32 %s1686_s3, 4  ;;  %s1123_s30 = int_to_ptr.vmem [resolvable:$true] %s1122_s30 }
 0x15d   :  { %v1385_v6 = vpop.eup %1384  ;;  %1398 = vpow2.f32 %v1166_v1  ;;  %v1295_v7 = vpop.f32.mrf.mxu0  ;;  %vm537_vm7 = vcmp.gt.f32.partialorder %v521_v4, 0.0  ;;  %s1644_s8 = scalar_lea.vmem %s1123_s30, 4096  ;;  %p1649_p12 = scmp.lt.s32.totalorder %s1123_s30, %s1123_s30 }
 0x15e   :  { %v1387_v8 = vpop.eup %1386  ;;  %v462_v9 = vadd.f32 1.0, %v1385_v6  ;;  %v1167_v10 = vmul.f32 -1.442695, %v398_v5  ;;  %v1296_v11 = vadd.f32 %v1295_v7, %v1294_v3  ;;  %vm1189_vm8 = vmpackc.low %vm537_vm7, %vm536_vm6  ;;  %v1788_v60 = vrot.slane %v151_v58, %v155_v57  ;;  %p1645_p11 = scmp.ne.s32.totalorder %s1123_s30, %s1644_s8  ;;  %p1650_p13 = scmp.lt.s32.totalorder %s1644_s8, %s1644_s8 }
 0x15f   :  { %1190 = vmatmul.mubr.msk.bf16.gmra.mxu1 %vm1189_vm8, %v1684_v35  ;;  %v522_v17 = vsub.f32 %v1387_v8, %v506_v12 }
 0x160   :  { %1400 = vrcp.f32 %v462_v9  ;;  %v401_v13 = vadd.f32 %v1296_v11, %v1752_v18  ;;  %714 = vmatprep.mubr.bf16.mxu1 %v1683_v16  ;;  %v509_v18 = vld [vmem:[#allocation8 + $0x48] sm:$0xff]  ;;  %p1651_p0 = por %p1650_p13, %p1649_p12 }
 0x161   :  { %v1389_v15 = vpop.eup %1388  ;;  %1402 = vpow2.f32 %v1167_v10  ;;  %vm538_vm9 = vcmp.gt.f32.partialorder %v522_v17, 0.0 }
 0x162   :  { %v1391_v19 = vpop.eup %1390  ;;  %v463_v20 = vadd.f32 1.0, %v1389_v15  ;;  %v1168_v21 = vmul.f32 -1.442695, %v401_v13  ;;  %p1652_p1 = pnand %p1651_p0, %p1645_p11 }
 0x163   :  { %v523_v22 = vsub.f32 %v1391_v19, %v507_v14 }
 0x164   :  { %1404 = vrcp.f32 %v463_v20 }
 0x165   :  { %v1393_v23 = vpop.eup %1392  ;;  %1406 = vpow2.f32 %v1168_v21  ;;  %vm539_vm10 = vcmp.gt.f32.partialorder %v523_v22, 0.0 }
 0x166   :  { %v1395_v25 = vpop.eup %1394  ;;  %vm1191_vm11 = vmpackc.low %vm539_vm10, %vm538_vm9  ;;  %v524_v27 = vsub.f32 %v1393_v23, %v508_v24 }
 0x167   :  { %v464_v26 = vadd.f32 1.0, %v1395_v25  ;;  %1192 = vmatmul.mubr.msk.bf16.gmra.mxu1 %vm1191_vm11, %v1684_v35 }
 0x168   :  { %724 = vmatprep.mubr.bf16.mxu1 %v1683_v16  ;;  %vm540_vm12 = vcmp.gt.f32.partialorder %v524_v27, 0.0 }
 0x169   :  { %v1397_v28 = vpop.eup %1396  ;;  %1408 = vrcp.f32 %v464_v26 }
 0x16a   :  { %v1399_v29 = vpop.eup %1398  ;;  %v525_v30 = vsub.f32 %v1397_v28, %v509_v18 }
 0x16b   :  { %v465_v31 = vadd.f32 1.0, %v1399_v29 }
 0x16c   :  { %vm541_vm13 = vcmp.gt.f32.partialorder %v525_v30, 0.0 }
 0x16d   :  { %v1401_v32 = vpop.eup %1400  ;;  %1410 = vrcp.f32 %v465_v31  ;;  %vm1193_vm14 = vmpackc.low %vm541_vm13, %vm540_vm12 }
 0x16e   :  { %v1403_v34 = vpop.eup %1402  ;;  %v526_v38 = vsub.f32 %v1401_v32, %v510_v33 }
 0x16f   :  { %v466_v36 = vadd.f32 1.0, %v1403_v34  ;;  %1194 = vmatmul.mubr.msk.bf16.gmra.mxu1 %vm1193_vm14, %v1684_v35 }
 0x170   :  { %734 = vmatprep.mubr.bf16.mxu1 %v1683_v16  ;;  %vm542_vm15 = vcmp.gt.f32.partialorder %v526_v38, 0.0 }
 0x171   :  { %v1405_v39 = vpop.eup %1404  ;;  %1412 = vrcp.f32 %v466_v36 }
 0x172   :  { %v1407_v40 = vpop.eup %1406  ;;  %v527_v41 = vsub.f32 %v1405_v39, %v511_v37 }
 0x173   :  { %v467_v42 = vadd.f32 1.0, %v1407_v40 }
 0x174   :  { %vm543_vm0 = vcmp.gt.f32.partialorder %v527_v41, 0.0 }
 0x175   :  { %1414 = vrcp.f32 %v467_v42  ;;  %vm1195_vm1 = vmpackc.low %vm543_vm0, %vm542_vm15 }
 0x176   :  { %v1409_v43 = vpop.eup %1408 }
 0x177   :  { %1196 = vmatmul.mubr.msk.bf16.gmra.mxu1 %vm1195_vm1, %v1684_v35  ;;  %v528_v46 = vsub.f32 %v1409_v43, %v512_v44 }
 0x178   :  { %744 = vmatprep.mubr.bf16.mxu1 %v1683_v16 }
 0x179   :  { %vm544_vm2 = vcmp.gt.f32.partialorder %v528_v46, 0.0 }
 0x17a   :  { %v1411_v47 = vpop.eup %1410 }
 0x17b   :  { %v529_v48 = vsub.f32 %v1411_v47, %v513_v45 }
 0x17d   :  { %vm545_vm3 = vcmp.gt.f32.partialorder %v529_v48, 0.0 }
 0x17e   :  { %v1413_v49 = vpop.eup %1412  ;;  %vm1197_vm4 = vmpackc.low %vm545_vm3, %vm544_vm2 }
 0x17f   :  { %1198 = vmatmul.mubr.msk.bf16.gmra.mxu1 %vm1197_vm4, %v1684_v35  ;;  %v530_v52 = vsub.f32 %v1413_v49, %v514_v50 }
 0x180   :  { %754 = vmatprep.mubr.bf16.mxu1 %v1683_v16  ;;  %v1790_v16 = vrot.slane %v151_v58, %v159_v59  ;;  %v957_v58 = vld [vmem:[#allocation10] sm:$0xff] }
 0x181   :  { %vm546_vm5 = vcmp.gt.f32.partialorder %v530_v52, 0.0 }
 0x182   :  { %v1415_v53 = vpop.eup %1414 }
 0x183   :  { %v531_v54 = vsub.f32 %v1415_v53, %v515_v51 }
 0x185   :  { %vm547_vm6 = vcmp.gt.f32.partialorder %v531_v54, 0.0 }
 0x186   :  { %vm1199_vm7 = vmpackc.low %vm547_vm6, %vm546_vm5 }
 0x187   :  { %1200 = vmatmul.mubr.msk.bf16.gmra.mxu1 %vm1199_vm7, %v1684_v35 }
 0x20e   :  { %v686_v61 = vpop.f32.mrf.mxu1 }
 0x20f   :  { %v687_v62 = vadd.f32 %v686_v61, %v1788_v60 }
 0x210   :  { %v688_v63 = vpop.f32.mrf.mxu1 }
 0x211   :  { %v1201_v0 = vmul.f32 -1.442695, %v687_v62  ;;  %v689_v1 = vadd.f32 %v688_v63, %v1790_v16 }
 0x212   :  { %v690_v35 = vpop.f32.mrf.mxu1 }
 0x213   :  { %1416 = vpow2.f32 %v1201_v0  ;;  %v1202_v2 = vmul.f32 -1.442695, %v689_v1  ;;  %v691_v3 = vadd.f32 %v690_v35, %v1788_v60  ;;  %v958_v1 = vld [vmem:[#allocation10 + $0x8] sm:$0xff] }
 0x214   :  { %v692_v4 = vpop.f32.mrf.mxu1 }
 0x215   :  { %1418 = vpow2.f32 %v1202_v2  ;;  %v1203_v5 = vmul.f32 -1.442695, %v691_v3  ;;  %v693_v6 = vadd.f32 %v692_v4, %v1790_v16 }
 0x216   :  { %v696_v7 = vpop.f32.mrf.mxu1 }
 0x217   :  { %1420 = vpow2.f32 %v1203_v5  ;;  %v1204_v8 = vmul.f32 -1.442695, %v693_v6  ;;  %v697_v9 = vadd.f32 %v696_v7, %v1788_v60  ;;  %v959_v7 = vld [vmem:[#allocation10 + $0x10] sm:$0xff] }
 0x218   :  { %v698_v10 = vpop.f32.mrf.mxu1 }
 0x219   :  { %1422 = vpow2.f32 %v1204_v8  ;;  %v1205_v11 = vmul.f32 -1.442695, %v697_v9  ;;  %v699_v12 = vadd.f32 %v698_v10, %v1790_v16 }
 0x21a   :  { %v700_v13 = vpop.f32.mrf.mxu1 }
 0x21b   :  { %1424 = vpow2.f32 %v1205_v11  ;;  %v1206_v14 = vmul.f32 -1.442695, %v699_v12  ;;  %v701_v15 = vadd.f32 %v700_v13, %v1788_v60 }
 0x21c   :  { %v702_v17 = vpop.f32.mrf.mxu1 }
 0x21d   :  { %1426 = vpow2.f32 %v1206_v14  ;;  %v1207_v19 = vmul.f32 -1.442695, %v701_v15  ;;  %v703_v20 = vadd.f32 %v702_v17, %v1790_v16  ;;  %v1685_v15 = vmov 0.0  }
 0x21f   :  { %1428 = vpow2.f32 %v1207_v19  ;;  %v1208_v21 = vmul.f32 -1.442695, %v703_v20  ;;  %v706_v22 = vpop.f32.mrf.mxu1  ;;  %v960_v19 = vld [vmem:[#allocation10 + $0x18] sm:$0xff] }
 0x220   :  { %v1417_v23 = vpop.eup %1416  ;;  %v707_v24 = vadd.f32 %v706_v22, %v1788_v60 }
 0x221   :  { %v861_v25 = vadd.f32 1.0, %v1417_v23  ;;  %1430 = vpow2.f32 %v1208_v21  ;;  %v708_v26 = vpop.f32.mrf.mxu1 }
 0x222   :  { %v1419_v18 = vpop.eup %1418  ;;  %v1209_v27 = vmul.f32 -1.442695, %v707_v24  ;;  %v709_v28 = vadd.f32 %v708_v26, %v1790_v16 }
 0x223   :  { %1432 = vrcp.f32 %v861_v25  ;;  %v862_v29 = vadd.f32 1.0, %v1419_v18  ;;  %v710_v30 = vpop.f32.mrf.mxu1 }
 0x224   :  { %v1421_v31 = vpop.eup %1420  ;;  %1434 = vpow2.f32 %v1209_v27  ;;  %v1210_v32 = vmul.f32 -1.442695, %v709_v28  ;;  %v711_v33 = vadd.f32 %v710_v30, %v1788_v60  ;;  %v961_v27 = vld [vmem:[#allocation10 + $0x20] sm:$0xff] }
 0x225   :  { %1436 = vrcp.f32 %v862_v29  ;;  %v863_v34 = vadd.f32 1.0, %v1421_v31  ;;  %v712_v36 = vpop.f32.mrf.mxu1 }
 0x226   :  { %v1423_v37 = vpop.eup %1422  ;;  %1438 = vpow2.f32 %v1210_v32  ;;  %v1211_v38 = vmul.f32 -1.442695, %v711_v33  ;;  %v713_v39 = vadd.f32 %v712_v36, %v1790_v16 }
 0x227   :  { %1440 = vrcp.f32 %v863_v34  ;;  %v864_v40 = vadd.f32 1.0, %v1423_v37  ;;  %v716_v41 = vpop.f32.mrf.mxu1  ;;  %v962_v37 = vld [vmem:[#allocation10 + $0x28] sm:$0xff] }
 0x228   :  { %v1425_v42 = vpop.eup %1424  ;;  %1442 = vpow2.f32 %v1211_v38  ;;  %v1212_v43 = vmul.f32 -1.442695, %v713_v39  ;;  %v717_v44 = vadd.f32 %v716_v41, %v1788_v60 }
 0x229   :  { %1444 = vrcp.f32 %v864_v40  ;;  %v865_v45 = vadd.f32 1.0, %v1425_v42  ;;  %v718_v46 = vpop.f32.mrf.mxu1 }
 0x22a   :  { %v1427_v47 = vpop.eup %1426  ;;  %1446 = vpow2.f32 %v1212_v43  ;;  %v1213_v48 = vmul.f32 -1.442695, %v717_v44  ;;  %v719_v49 = vadd.f32 %v718_v46, %v1790_v16  ;;  %v963_v46 = vld [vmem:[#allocation10 + $0x30] sm:$0xff] }
 0x22b   :  { %1448 = vrcp.f32 %v865_v45  ;;  %v866_v50 = vadd.f32 1.0, %v1427_v47  ;;  %v720_v51 = vpop.f32.mrf.mxu1 }
 0x22c   :  { %v1429_v52 = vpop.eup %1428  ;;  %1450 = vpow2.f32 %v1213_v48  ;;  %v1214_v53 = vmul.f32 -1.442695, %v719_v49  ;;  %v721_v54 = vadd.f32 %v720_v51, %v1788_v60 }
 0x22d   :  { %1452 = vrcp.f32 %v866_v50  ;;  %v867_v55 = vadd.f32 1.0, %v1429_v52  ;;  %v722_v56 = vpop.f32.mrf.mxu1 }
 0x22e   :  { %v1431_v57 = vpop.eup %1430  ;;  %1454 = vpow2.f32 %v1214_v53  ;;  %v1215_v59 = vmul.f32 -1.442695, %v721_v54  ;;  %v723_v61 = vadd.f32 %v722_v56, %v1790_v16 }
 0x22f   :  { %1456 = vrcp.f32 %v867_v55  ;;  %v868_v62 = vadd.f32 1.0, %v1431_v57  ;;  %v726_v63 = vpop.f32.mrf.mxu1  ;;  %v964_v55 = vld [vmem:[#allocation10 + $0x38] sm:$0xff] }
 0x230   :  { %v1433_v0 = vpop.eup %1432  ;;  %1458 = vpow2.f32 %v1215_v59  ;;  %v1216_v35 = vmul.f32 -1.442695, %v723_v61  ;;  %v727_v2 = vadd.f32 %v726_v63, %v1788_v60 }
 0x231   :  { %v1435_v3 = vpop.eup %1434  ;;  %v989_v4 = vsub.f32 %v1433_v0, %v957_v58  ;;  %1460 = vrcp.f32 %v868_v62  ;;  %v728_v5 = vpop.f32.mrf.mxu1 }
 0x232   :  { %v1437_v6 = vpop.eup %1436  ;;  %v869_v8 = vadd.f32 1.0, %v1435_v3  ;;  %1462 = vpow2.f32 %v1216_v35  ;;  %v1217_v9 = vmul.f32 -1.442695, %v727_v2  ;;  %v729_v10 = vadd.f32 %v728_v5, %v1790_v16 }
 0x233   :  { %v1439_v11 = vpop.eup %1438  ;;  %vm1021_vm8 = vcmp.gt.f32.partialorder %v989_v4, 0.0  ;;  %v990_v12 = vsub.f32 %v1437_v6, %v958_v1  ;;  %v730_v13 = vpop.f32.mrf.mxu1  ;;  %v965_v4 = vld [vmem:[#allocation10 + $0x40] sm:$0xff] }
 0x234   :  { %v1441_v14 = vpop.eup %1440  ;;  %v1053_v17 = vsel %vm1021_vm8, 1.0, %v1685_v15  ;;  %1464 = vrcp.f32 %v869_v8  ;;  %v870_v20 = vadd.f32 1.0, %v1439_v11  ;;  %v1218_v21 = vmul.f32 -1.442695, %v729_v10  ;;  %v966_v11 = vld [vmem:[#allocation10 + $0x48] sm:$0xff] }
 0x235   :  { %v1443_v22 = vpop.eup %1442  ;;  %1085 = vst [vmem:[#allocation11] sm:$0xff] %v1053_v17  ;;  %vm1022_vm9 = vcmp.gt.f32.partialorder %v990_v12, 0.0  ;;  %v991_v23 = vsub.f32 %v1441_v14, %v959_v7  ;;  %1466 = vpow2.f32 %v1217_v9  ;;  %v731_v24 = vadd.f32 %v730_v13, %v1788_v60  ;;  %v732_v25 = vpop.f32.mrf.mxu1 }
 0x236   :  { %v1445_v26 = vpop.eup %1444  ;;  %v1054_v18 = vsel %vm1022_vm9, 1.0, %v1685_v15  ;;  %1468 = vrcp.f32 %v870_v20  ;;  %v871_v28 = vadd.f32 1.0, %v1443_v22  ;;  %v733_v29 = vadd.f32 %v732_v25, %v1790_v16  ;;  %v967_v22 = vld [vmem:[#allocation10 + $0x50] sm:$0xff] }
 0x237   :  { %v1447_v30 = vpop.eup %1446  ;;  %1086 = vst [vmem:[#allocation11 + $0x8] sm:$0xff] %v1054_v18  ;;  %vm1023_vm10 = vcmp.gt.f32.partialorder %v991_v23, 0.0  ;;  %v992_v31 = vsub.f32 %v1445_v26, %v960_v19  ;;  %1470 = vpow2.f32 %v1218_v21  ;;  %v1219_v32 = vmul.f32 -1.442695, %v731_v24  ;;  %v736_v33 = vpop.f32.mrf.mxu1 }
 0x238   :  { %v1449_v34 = vpop.eup %1448  ;;  %v1055_v36 = vsel %vm1023_vm10, 1.0, %v1685_v15  ;;  %1472 = vrcp.f32 %v871_v28  ;;  %v872_v38 = vadd.f32 1.0, %v1447_v30  ;;  %v1220_v39 = vmul.f32 -1.442695, %v733_v29 }
 0x239   :  { %v1451_v40 = vpop.eup %1450  ;;  %1087 = vst [vmem:[#allocation11 + $0x10] sm:$0xff] %v1055_v36  ;;  %vm1024_vm11 = vcmp.gt.f32.partialorder %v992_v31, 0.0  ;;  %v993_v41 = vsub.f32 %v1449_v34, %v961_v27  ;;  %1474 = vpow2.f32 %v1219_v32  ;;  %v737_v42 = vadd.f32 %v736_v33, %v1788_v60  ;;  %v738_v43 = vpop.f32.mrf.mxu1  ;;  %v968_v31 = vld [vmem:[#allocation10 + $0x58] sm:$0xff] }
 0x23a   :  { %v1453_v44 = vpop.eup %1452  ;;  %v1056_v45 = vsel %vm1024_vm11, 1.0, %v1685_v15  ;;  %1476 = vrcp.f32 %v872_v38  ;;  %v873_v47 = vadd.f32 1.0, %v1451_v40  ;;  %v739_v48 = vadd.f32 %v738_v43, %v1790_v16  ;;  %v969_v40 = vld [vmem:[#allocation10 + $0x60] sm:$0xff] }
 0x23b   :  { %v1455_v49 = vpop.eup %1454  ;;  %1088 = vst [vmem:[#allocation11 + $0x18] sm:$0xff] %v1056_v45  ;;  %vm1025_vm12 = vcmp.gt.f32.partialorder %v993_v41, 0.0  ;;  %v994_v50 = vsub.f32 %v1453_v44, %v962_v37  ;;  %1478 = vpow2.f32 %v1220_v39  ;;  %v1221_v51 = vmul.f32 -1.442695, %v737_v42  ;;  %v740_v52 = vpop.f32.mrf.mxu1 }
 0x23c   :  { %v1457_v53 = vpop.eup %1456  ;;  %v1057_v54 = vsel %vm1025_vm12, 1.0, %v1685_v15  ;;  %1480 = vrcp.f32 %v873_v47  ;;  %v874_v56 = vadd.f32 1.0, %v1455_v49  ;;  %v1222_v57 = vmul.f32 -1.442695, %v739_v48  ;;  %v970_v49 = vld [vmem:[#allocation10 + $0x68] sm:$0xff] }
 0x23d   :  { %v1459_v58 = vpop.eup %1458  ;;  %1089 = vst [vmem:[#allocation11 + $0x20] sm:$0xff] %v1057_v54  ;;  %vm1026_vm13 = vcmp.gt.f32.partialorder %v994_v50, 0.0  ;;  %v995_v59 = vsub.f32 %v1457_v53, %v963_v46  ;;  %1482 = vpow2.f32 %v1221_v51  ;;  %v741_v61 = vadd.f32 %v740_v52, %v1788_v60  ;;  %v742_v62 = vpop.f32.mrf.mxu1 }
 0x23e   :  { %v1461_v63 = vpop.eup %1460  ;;  %v1058_v0 = vsel %vm1026_vm13, 1.0, %v1685_v15  ;;  %1484 = vrcp.f32 %v874_v56  ;;  %v875_v1 = vadd.f32 1.0, %v1459_v58  ;;  %v743_v35 = vadd.f32 %v742_v62, %v1790_v16  ;;  %v971_v58 = vld [vmem:[#allocation10 + $0x70] sm:$0xff] }
 0x23f   :  { %v1463_v2 = vpop.eup %1462  ;;  %1090 = vst [vmem:[#allocation11 + $0x28] sm:$0xff] %v1058_v0  ;;  %vm1027_vm14 = vcmp.gt.f32.partialorder %v995_v59, 0.0  ;;  %v996_v3 = vsub.f32 %v1461_v63, %v964_v55  ;;  %1486 = vpow2.f32 %v1222_v57  ;;  %v1223_v5 = vmul.f32 -1.442695, %v741_v61  ;;  %v746_v6 = vpop.f32.mrf.mxu1 }
 0x240   :  { %v1059_v7 = vsel %vm1027_vm14, 1.0, %v1685_v15  ;;  %1488 = vrcp.f32 %v875_v1  ;;  %v876_v8 = vadd.f32 1.0, %v1463_v2  ;;  %v1224_v9 = vmul.f32 -1.442695, %v743_v35 }
 0x241   :  { %v1465_v10 = vpop.eup %1464  ;;  %1091 = vst [vmem:[#allocation11 + $0x30] sm:$0xff] %v1059_v7  ;;  %vm1028_vm15 = vcmp.gt.f32.partialorder %v996_v3, 0.0  ;;  %1490 = vpow2.f32 %v1223_v5  ;;  %v747_v12 = vadd.f32 %v746_v6, %v1788_v60  ;;  %v748_v13 = vpop.f32.mrf.mxu1  ;;  %v972_v3 = vld [vmem:[#allocation10 + $0x78] sm:$0xff] }
 0x242   :  { %v1467_v14 = vpop.eup %1466  ;;  %v1060_v17 = vsel %vm1028_vm15, 1.0, %v1685_v15  ;;  %v997_v19 = vsub.f32 %v1465_v10, %v965_v4  ;;  %1492 = vrcp.f32 %v876_v8  ;;  %v749_v20 = vadd.f32 %v748_v13, %v1790_v16 }
 0x243   :  { %v1469_v21 = vpop.eup %1468  ;;  %1092 = vst [vmem:[#allocation11 + $0x38] sm:$0xff] %v1060_v17  ;;  %v877_v23 = vadd.f32 1.0, %v1467_v14  ;;  %1494 = vpow2.f32 %v1224_v9  ;;  %v1225_v24 = vmul.f32 -1.442695, %v747_v12  ;;  %v750_v25 = vpop.f32.mrf.mxu1  ;;  %v973_v17 = vld [vmem:[#allocation10 + $0x80] sm:$0xff] }
 0x244   :  { %v1471_v26 = vpop.eup %1470  ;;  %vm1029_vm0 = vcmp.gt.f32.partialorder %v997_v19, 0.0  ;;  %v998_v18 = vsub.f32 %v1469_v21, %v966_v11  ;;  %v1226_v27 = vmul.f32 -1.442695, %v749_v20  ;;  %v751_v28 = vadd.f32 %v750_v25, %v1788_v60 }
 0x245   :  { %v1473_v29 = vpop.eup %1472  ;;  %v1061_v30 = vsel %vm1029_vm0, 1.0, %v1685_v15  ;;  %1496 = vrcp.f32 %v877_v23  ;;  %v878_v32 = vadd.f32 1.0, %v1471_v26  ;;  %v752_v33 = vpop.f32.mrf.mxu1  ;;  %v974_v23 = vld [vmem:[#allocation10 + $0x88] sm:$0xff] }
 0x246   :  { %v1475_v34 = vpop.eup %1474  ;;  %1093 = vst [vmem:[#allocation11 + $0x40] sm:$0xff] %v1061_v30  ;;  %vm1030_vm1 = vcmp.gt.f32.partialorder %v998_v18, 0.0  ;;  %v999_v36 = vsub.f32 %v1473_v29, %v967_v22  ;;  %1498 = vpow2.f32 %v1225_v24  ;;  %v1227_v37 = vmul.f32 -1.442695, %v751_v28  ;;  %v975_v18 = vld [vmem:[#allocation10 + $0x90] sm:$0xff] }
 0x247   :  { %v1477_v38 = vpop.eup %1476  ;;  %v1062_v39 = vsel %vm1030_vm1, 1.0, %v1685_v15  ;;  %1500 = vrcp.f32 %v878_v32  ;;  %v879_v41 = vadd.f32 1.0, %v1475_v34  ;;  %v753_v42 = vadd.f32 %v752_v33, %v1790_v16  ;;  %v756_v43 = vpop.f32.mrf.mxu1  ;;  %v976_v32 = vld [vmem:[#allocation10 + $0x98] sm:$0xff] }
 0x248   :  { %v1479_v44 = vpop.eup %1478  ;;  %1094 = vst [vmem:[#allocation11 + $0x48] sm:$0xff] %v1062_v39  ;;  %vm1031_vm2 = vcmp.gt.f32.partialorder %v999_v36, 0.0  ;;  %v1000_v45 = vsub.f32 %v1477_v38, %v968_v31  ;;  %1502 = vpow2.f32 %v1226_v27  ;;  %v757_v46 = vadd.f32 %v756_v43, %v1788_v60  ;;  %v977_v39 = vld [vmem:[#allocation10 + $0xa0] sm:$0xff] }
 0x249   :  { %v1481_v47 = vpop.eup %1480  ;;  %v1063_v48 = vsel %vm1031_vm2, 1.0, %v1685_v15  ;;  %1504 = vrcp.f32 %v879_v41  ;;  %v880_v50 = vadd.f32 1.0, %v1479_v44  ;;  %v1228_v51 = vmul.f32 -1.442695, %v753_v42  ;;  %v758_v52 = vpop.f32.mrf.mxu1 }
 0x24a   :  { %v1483_v53 = vpop.eup %1482  ;;  %1095 = vst [vmem:[#allocation11 + $0x50] sm:$0xff] %v1063_v48  ;;  %vm1032_vm3 = vcmp.gt.f32.partialorder %v1000_v45, 0.0  ;;  %v1001_v54 = vsub.f32 %v1481_v47, %v969_v40  ;;  %1506 = vpow2.f32 %v1227_v37  ;;  %v1229_v55 = vmul.f32 -1.442695, %v757_v46  ;;  %v978_v45 = vld [vmem:[#allocation10 + $0xa8] sm:$0xff] }
 0x24b   :  { %v1485_v56 = vpop.eup %1484  ;;  %v1064_v57 = vsel %vm1032_vm3, 1.0, %v1685_v15  ;;  %1508 = vrcp.f32 %v880_v50  ;;  %v881_v59 = vadd.f32 1.0, %v1483_v53  ;;  %v759_v61 = vadd.f32 %v758_v52, %v1790_v16  ;;  %v760_v62 = vpop.f32.mrf.mxu1 }
 0x24c   :  { %v1487_v63 = vpop.eup %1486  ;;  %1096 = vst [vmem:[#allocation11 + $0x58] sm:$0xff] %v1064_v57  ;;  %vm1033_vm4 = vcmp.gt.f32.partialorder %v1001_v54, 0.0  ;;  %v1002_v0 = vsub.f32 %v1485_v56, %v970_v49  ;;  %1510 = vpow2.f32 %v1228_v51  ;;  %v761_v1 = vadd.f32 %v760_v62, %v1788_v60  ;;  %v979_v51 = vld [vmem:[#allocation10 + $0xb0] sm:$0xff]  ;;  %v980_v57 = vld [vmem:[#allocation10 + $0xb8] sm:$0xff] }
 0x24d   :  { %v1489_v35 = vpop.eup %1488  ;;  %v1065_v2 = vsel %vm1033_vm4, 1.0, %v1685_v15  ;;  %1512 = vrcp.f32 %v881_v59  ;;  %v882_v4 = vadd.f32 1.0, %v1487_v63  ;;  %v1230_v5 = vmul.f32 -1.442695, %v759_v61  ;;  %v762_v6 = vpop.f32.mrf.mxu1 }
 0x24e   :  { %v1491_v7 = vpop.eup %1490  ;;  %1097 = vst [vmem:[#allocation11 + $0x60] sm:$0xff] %v1065_v2  ;;  %vm1034_vm5 = vcmp.gt.f32.partialorder %v1002_v0, 0.0  ;;  %v1003_v8 = vsub.f32 %v1489_v35, %v971_v58  ;;  %1514 = vpow2.f32 %v1229_v55  ;;  %v1231_v9 = vmul.f32 -1.442695, %v761_v1  ;;  %v981_v2 = vld [vmem:[#allocation10 + $0xc0] sm:$0xff] }
 0x24f   :  { %v1493_v10 = vpop.eup %1492  ;;  %v1066_v11 = vsel %vm1034_vm5, 1.0, %v1685_v15  ;;  %1516 = vrcp.f32 %v882_v4  ;;  %v883_v12 = vadd.f32 1.0, %v1491_v7  ;;  %v763_v60 = vadd.f32 %v762_v6, %v1790_v16  ;;  %v982_v6 = vld [vmem:[#allocation10 + $0xc8] sm:$0xff] }
 0x250   :  { %v1495_v13 = vpop.eup %1494  ;;  %1098 = vst [vmem:[#allocation11 + $0x68] sm:$0xff] %v1066_v11  ;;  %vm1035_vm6 = vcmp.gt.f32.partialorder %v1003_v8, 0.0  ;;  %v1004_v14 = vsub.f32 %v1493_v10, %v972_v3  ;;  %1518 = vpow2.f32 %v1230_v5  ;;  %v983_v10 = vld [vmem:[#allocation10 + $0xd0] sm:$0xff] }
 0x251   :  { %v1067_v19 = vsel %vm1035_vm6, 1.0, %v1685_v15  ;;  %1520 = vrcp.f32 %v883_v12  ;;  %v884_v20 = vadd.f32 1.0, %v1495_v13  ;;  %v1232_v21 = vmul.f32 -1.442695, %v763_v60  ;;  %v984_v13 = vld [vmem:[#allocation10 + $0xd8] sm:$0xff] }
 0x252   :  { %v1497_v22 = vpop.eup %1496  ;;  %1099 = vst [vmem:[#allocation11 + $0x70] sm:$0xff] %v1067_v19  ;;  %vm1036_vm7 = vcmp.gt.f32.partialorder %v1004_v14, 0.0  ;;  %1522 = vpow2.f32 %v1231_v9 }
 0x253   :  { %v1499_v24 = vpop.eup %1498  ;;  %v1068_v25 = vsel %vm1036_vm7, 1.0, %v1685_v15  ;;  %v1005_v16 = vsub.f32 %v1497_v22, %v973_v17  ;;  %1524 = vrcp.f32 %v884_v20  ;;  %v985_v20 = vld [vmem:[#allocation10 + $0xe0] sm:$0xff] }
 0x254   :  { %v1501_v26 = vpop.eup %1500  ;;  %1100 = vst [vmem:[#allocation11 + $0x78] sm:$0xff] %v1068_v25  ;;  %v885_v27 = vadd.f32 1.0, %v1499_v24  ;;  %1526 = vpow2.f32 %v1232_v21  ;;  %v986_v24 = vld [vmem:[#allocation10 + $0xe8] sm:$0xff] }
 0x255   :  { %v1503_v28 = vpop.eup %1502  ;;  %vm1037_vm8 = vcmp.gt.f32.partialorder %v1005_v16, 0.0  ;;  %v1006_v29 = vsub.f32 %v1501_v26, %v974_v23 }
 0x256   :  { %v1505_v30 = vpop.eup %1504  ;;  %v1069_v31 = vsel %vm1037_vm8, 1.0, %v1685_v15  ;;  %1528 = vrcp.f32 %v885_v27  ;;  %v886_v33 = vadd.f32 1.0, %v1503_v28 }
 0x257   :  { %v1507_v34 = vpop.eup %1506  ;;  %1101 = vst [vmem:[#allocation11 + $0x80] sm:$0xff] %v1069_v31  ;;  %vm1038_vm9 = vcmp.gt.f32.partialorder %v1006_v29, 0.0  ;;  %v1007_v36 = vsub.f32 %v1505_v30, %v975_v18  ;;  %v987_v18 = vld [vmem:[#allocation10 + $0xf0] sm:$0xff]  ;;  %v988_v30 = vld [vmem:[#allocation10 + $0xf8] sm:$0xff] }
 0x258   :  { %v1509_v37 = vpop.eup %1508  ;;  %v1070_v38 = vsel %vm1038_vm9, 1.0, %v1685_v15  ;;  %1530 = vrcp.f32 %v886_v33  ;;  %v887_v40 = vadd.f32 1.0, %v1507_v34 }
 0x259   :  { %v1511_v41 = vpop.eup %1510  ;;  %1102 = vst [vmem:[#allocation11 + $0x88] sm:$0xff] %v1070_v38  ;;  %vm1039_vm10 = vcmp.gt.f32.partialorder %v1007_v36, 0.0  ;;  %v1008_v42 = vsub.f32 %v1509_v37, %v976_v32 }
 0x25a   :  { %v1513_v43 = vpop.eup %1512  ;;  %v1071_v44 = vsel %vm1039_vm10, 1.0, %v1685_v15  ;;  %1532 = vrcp.f32 %v887_v40  ;;  %v888_v46 = vadd.f32 1.0, %v1511_v41 }
 0x25b   :  { %v1515_v47 = vpop.eup %1514  ;;  %1103 = vst [vmem:[#allocation11 + $0x90] sm:$0xff] %v1071_v44  ;;  %vm1040_vm11 = vcmp.gt.f32.partialorder %v1008_v42, 0.0  ;;  %v1009_v48 = vsub.f32 %v1513_v43, %v977_v39 }
 0x25c   :  { %v1517_v49 = vpop.eup %1516  ;;  %v1072_v50 = vsel %vm1040_vm11, 1.0, %v1685_v15  ;;  %1534 = vrcp.f32 %v888_v46  ;;  %v889_v52 = vadd.f32 1.0, %v1515_v47 }
 0x25d   :  { %v1519_v53 = vpop.eup %1518  ;;  %1104 = vst [vmem:[#allocation11 + $0x98] sm:$0xff] %v1072_v50  ;;  %vm1041_vm12 = vcmp.gt.f32.partialorder %v1009_v48, 0.0  ;;  %v1010_v54 = vsub.f32 %v1517_v49, %v978_v45 }
 0x25e   :  { %v1521_v55 = vpop.eup %1520  ;;  %v1073_v56 = vsel %vm1041_vm12, 1.0, %v1685_v15  ;;  %1536 = vrcp.f32 %v889_v52  ;;  %v890_v58 = vadd.f32 1.0, %v1519_v53 }
 0x25f   :  { %v1523_v59 = vpop.eup %1522  ;;  %1105 = vst [vmem:[#allocation11 + $0xa0] sm:$0xff] %v1073_v56  ;;  %vm1042_vm13 = vcmp.gt.f32.partialorder %v1010_v54, 0.0  ;;  %v1011_v61 = vsub.f32 %v1521_v55, %v979_v51 }
 0x260   :  { %v1525_v62 = vpop.eup %1524  ;;  %v1074_v63 = vsel %vm1042_vm13, 1.0, %v1685_v15  ;;  %1538 = vrcp.f32 %v890_v58  ;;  %v891_v0 = vadd.f32 1.0, %v1523_v59 }
 0x261   :  { %v1527_v1 = vpop.eup %1526  ;;  %1106 = vst [vmem:[#allocation11 + $0xa8] sm:$0xff] %v1074_v63  ;;  %vm1043_vm14 = vcmp.gt.f32.partialorder %v1011_v61, 0.0  ;;  %v1012_v35 = vsub.f32 %v1525_v62, %v980_v57 }
 0x262   :  { %v1075_v3 = vsel %vm1043_vm14, 1.0, %v1685_v15  ;;  %1540 = vrcp.f32 %v891_v0  ;;  %v892_v4 = vadd.f32 1.0, %v1527_v1 }
 0x263   :  { %v1529_v5 = vpop.eup %1528  ;;  %1107 = vst [vmem:[#allocation11 + $0xb0] sm:$0xff] %v1075_v3  ;;  %vm1044_vm15 = vcmp.gt.f32.partialorder %v1012_v35, 0.0 }
 0x264   :  { %v1076_v7 = vsel %vm1044_vm15, 1.0, %v1685_v15  ;;  %v1013_v8 = vsub.f32 %v1529_v5, %v981_v2  ;;  %1542 = vrcp.f32 %v892_v4 }
 0x265   :  { %v1531_v9 = vpop.eup %1530  ;;  %1108 = vst [vmem:[#allocation11 + $0xb8] sm:$0xff] %v1076_v7 }
 0x266   :  { %vm1045_vm0 = vcmp.gt.f32.partialorder %v1013_v8, 0.0  ;;  %v1014_v11 = vsub.f32 %v1531_v9, %v982_v6 }
 0x267   :  { %v1533_v12 = vpop.eup %1532  ;;  %v1077_v60 = vsel %vm1045_vm0, 1.0, %v1685_v15 }
 0x268   :  { %1109 = vst [vmem:[#allocation11 + $0xc0] sm:$0xff] %v1077_v60  ;;  %vm1046_vm1 = vcmp.gt.f32.partialorder %v1014_v11, 0.0  ;;  %v1015_v14 = vsub.f32 %v1533_v12, %v983_v10 }
 0x269   :  { %v1535_v17 = vpop.eup %1534  ;;  %v1078_v19 = vsel %vm1046_vm1, 1.0, %v1685_v15 }
 0x26a   :  { %1110 = vst [vmem:[#allocation11 + $0xc8] sm:$0xff] %v1078_v19  ;;  %vm1047_vm2 = vcmp.gt.f32.partialorder %v1015_v14, 0.0  ;;  %v1016_v21 = vsub.f32 %v1535_v17, %v984_v13 }
 0x26b   :  { %v1537_v22 = vpop.eup %1536  ;;  %v1079_v23 = vsel %vm1047_vm2, 1.0, %v1685_v15 }
 0x26c   :  { %1111 = vst [vmem:[#allocation11 + $0xd0] sm:$0xff] %v1079_v23  ;;  %vm1048_vm3 = vcmp.gt.f32.partialorder %v1016_v21, 0.0  ;;  %v1017_v25 = vsub.f32 %v1537_v22, %v985_v20 }
 0x26d   :  { %v1539_v16 = vpop.eup %1538  ;;  %v1080_v26 = vsel %vm1048_vm3, 1.0, %v1685_v15 }
 0x26e   :  { %1112 = vst [vmem:[#allocation11 + $0xd8] sm:$0xff] %v1080_v26  ;;  %vm1049_vm4 = vcmp.gt.f32.partialorder %v1017_v25, 0.0  ;;  %v1018_v27 = vsub.f32 %v1539_v16, %v986_v24 }
 0x26f   :  { %v1541_v28 = vpop.eup %1540  ;;  %v1081_v29 = vsel %vm1049_vm4, 1.0, %v1685_v15 }
 0x270   :  { %1113 = vst [vmem:[#allocation11 + $0xe0] sm:$0xff] %v1081_v29  ;;  %vm1050_vm5 = vcmp.gt.f32.partialorder %v1018_v27, 0.0  ;;  %v1019_v31 = vsub.f32 %v1541_v28, %v987_v18 }
 0x271   :  { %v1543_v32 = vpop.eup %1542  ;;  %v1082_v33 = vsel %vm1050_vm5, 1.0, %v1685_v15 }
 0x272   :  { %1114 = vst [vmem:[#allocation11 + $0xe8] sm:$0xff] %v1082_v33  ;;  %vm1051_vm6 = vcmp.gt.f32.partialorder %v1019_v31, 0.0  ;;  %v1020_v34 = vsub.f32 %v1543_v32, %v988_v30 }
 0x273   :  { %v1083_v36 = vsel %vm1051_vm6, 1.0, %v1685_v15 }
 0x274   :  { %1115 = vst [vmem:[#allocation11 + $0xf0] sm:$0xff] %v1083_v36  ;;  %vm1052_vm7 = vcmp.gt.f32.partialorder %v1020_v34, 0.0 }
 0x275   :  { %v1084_v37 = vsel %vm1052_vm7, 1.0, %v1685_v15 }
 0x276   :  { %1116 = vst [vmem:[#allocation11 + $0xf8] sm:$0xff] %v1084_v37 }
 0x277   :  { %1655 = shalt.err (!%p1652_p1)
}
 0x278   :  { %1128 = dma.vmem_to_hbm [thread:$0]  %s1123_s30, 4096, %s1869_s7, [#allocation4], %s1679_s17, %s1679_s17, %s1680_s18  }
 0x279   :  { %1670 = dma.done.wait [#allocation4], 4096  }
 0x27a   :  { %1671 = vsyncadd [#allocation4], 4294963200 }
 0x27b   :  { %1132 = vsyncpa [#allocation3], 1 }
 0x27c   :  { %1133 = vsyncpa [#allocation6], 1 }
 0x27d   :  { %1134 = vsyncpa [#allocation9], 1 }
 0x27e   :  { %1135 = vsyncpa [#allocation4], 1 }

</bundles_post_ra>
